<compile_context>
chip_gen: v6e
topology: v6e:2x2x1
jax: 0.10.0
libtpu: 0.0.40
codegen_flags: <defaults>
</compile_context>

<pallas_src>
import functools

import jax
import jax.numpy as jnp
from jax.experimental import pallas as pl
from jax.experimental.pallas import tpu as pltpu


def _round_up(x: int, m: int) -> int:
    return ((x + m - 1) // m) * m


def _tile_dim(size: int, tile_max: int, align: int):
    """Tile one dim: full extent if it fits under the cap (-> no padding; the
    full-extent exemption covers ragged sizes), otherwise an aligned tile_max
    with the array padded up to a multiple of it (atypical path)."""
    if size <= tile_max:
        return size, size                       # (tile, padded size)
    assert tile_max % align == 0, (tile_max, align)
    return tile_max, _round_up(size, tile_max)


# ----------------------------------------------------------------------------
# Kernel: out[b, n, w] (+)= sum_k H_pinv[n, k] * x[b, k, w]
#   h_ref : (tn, tk)       compute_dtype (bf16 by default, prepared at init)
#   x_ref : (bb, tk, tw)   input dtype; cast to compute_dtype in-register
#   o_ref : (bb, tn, tw)   float32, accumulated in place across the K axis
# Grid is 4-D with K innermost; the output block index is constant along K, so
# the fp32 accumulation happens directly in the resident output block.
# ----------------------------------------------------------------------------
def _pinv_apply_kernel(h_ref, x_ref, o_ref, *, compute_dtype, precision,
                       accumulate):
    if accumulate:
        @pl.when(pl.program_id(3) == 0)
        def _init():
            o_ref[...] = jnp.zeros_like(o_ref)

    h = h_ref[...]                                   # (tn, tk)
    for b in range(x_ref.shape[0]):                  # bb is static -> unrolled
        xb = x_ref[b].astype(compute_dtype)          # in-VMEM cast, no HBM pass
        r = jnp.dot(h, xb, preferred_element_type=jnp.float32,
                    precision=precision)             # (tn, tw) fp32 on the MXU
        if accumulate:
            o_ref[b] += r
        else:
            o_ref[b] = r


@functools.partial(
    jax.jit,
    static_argnames=("n_out", "m_in", "tn", "tk", "tw_max", "compute_dtype",
                     "bb"))
def _pinv_apply(hp, x, *, n_out, m_in, tn, tk, tw_max, compute_dtype, bb=None):
    """out[b] = H_pinv @ x[b]; hp is the prepared (cast/padded) weight."""
    N_pad, M_pad = hp.shape
    B, M, W = x.shape
    assert M == m_in, f"x has M={M}, module was built with M={m_in}"

    cdt = jnp.dtype(compute_dtype)
    precision = (jax.lax.Precision.HIGHEST
                 if cdt == jnp.dtype(jnp.float32) else None)

    # Contraction dim: pad x only if M had to be tiled at init (M > tk cap);
    # the common case (M <= 1024) keeps tk == M and needs no per-call pad.
    if M_pad != M:
        x = jnp.pad(x, ((0, 0), (0, M_pad - M), (0, 0)))

    # W: full-extent block (no pad, no output slice) whenever W fits the cap.
    tw, W_pad = _tile_dim(W, tw_max, 128)
    if W_pad != W:
        x = jnp.pad(x, ((0, 0), (0, 0), (0, W_pad - W)))

    N_t, W_t, K_t = N_pad // tn, W_pad // tw, M_pad // tk

    # Batch packing: several images per grid step when the whole per-batch
    # matmul is a single small tile (amortizes the ~0.35us/step overhead), but
    # keep >= 2 batch steps when possible so both v7x TensorCores get work.
    if bb is None:
        if N_t == 1 and W_t == 1 and K_t == 1 and B > 1:
            want = max(1, (256 * 512) // max(tn * tw, 1))
            bb = max(1, min(B, want, -(-B // 2)))
        else:
            bb = 1
    bb = max(1, min(int(bb), B))
    while B % bb:                                    # keep bb a divisor of B
        bb -= 1
    B_t = B // bb

    # Grid ordering: K innermost (accumulation axis); i outermost so H_pinv's
    # block (which depends only on (i, k)) stays put across the inner j/b sweep
    # and is DMA'd ~N_t times total.  When H is constant over the whole grid
    # (N_t == K_t == 1) the order is free, so sort the parallel axes
    # largest-first to keep the leading parallel axis >= 2 (v7x megacore).
    extents = {"i": N_t, "j": W_t, "b": B_t, "k": K_t}
    if N_t == 1 and K_t == 1:
        par_order = sorted(("i", "j", "b"), key=lambda a: -extents[a])
    else:
        par_order = ["i", "j", "b"]
    order = list(par_order) + ["k"]
    pos = {a: p for p, a in enumerate(order)}
    grid = tuple(extents[a] for a in order)

    def _mk(fn):
        def index_map(*args):
            v = {a: args[pos[a]] for a in order}
            return fn(v["i"], v["j"], v["b"], v["k"])
        return index_map

    h_spec = pl.BlockSpec((tn, tk), _mk(lambda i, j, b, k: (i, k)))
    # Note: sweep pipeline_mode=pl.Buffered(3) on x_spec if a profile shows
    # exposed DMA on the K-innermost axis; default double-buffering otherwise.
    x_spec = pl.BlockSpec((bb, tk, tw), _mk(lambda i, j, b, k: (b, k, j)))
    o_spec = pl.BlockSpec((bb, tn, tw), _mk(lambda i, j, b, k: (b, i, j)))

    # VMEM: double-buffered input blocks + double-buffered fp32 output block.
    h_item = jnp.dtype(hp.dtype).itemsize
    x_item = jnp.dtype(x.dtype).itemsize
    vmem_needed = 2 * (tn * tk * h_item + bb * tk * tw * x_item
                       + bb * tn * tw * 4)
    try:  # per-generation cap (v5e/v6e: 128 MiB physical, v7x: 64 MiB)
        vmem_cap = int(pltpu.get_tpu_info().vmem_capacity_bytes)
    except Exception:
        vmem_cap = 64 << 20
    vmem_limit = int(min(max(vmem_needed + (2 << 20), 16 << 20),
                         max(32 << 20, (vmem_cap * 3) // 4)))

    # Cost estimate with the real per-tile fetch counts.
    h_tiles = N_t * (1 if K_t == 1 else W_t * B_t * K_t)
    bytes_accessed = (h_tiles * tn * tk * h_item          # H_pinv reads
                      + N_t * B * M_pad * W_pad * x_item  # x re-read per i
                      + B * N_pad * W_pad * 4)            # output writes
    cost = pl.CostEstimate(flops=2 * B * N_pad * M_pad * W_pad,
                           transcendentals=0,
                           bytes_accessed=int(bytes_accessed))

    kernel = functools.partial(_pinv_apply_kernel, compute_dtype=cdt,
                               precision=precision, accumulate=K_t > 1)

    out = pl.pallas_call(
        kernel,
        out_shape=jax.ShapeDtypeStruct((B, N_pad, W_pad), jnp.float32),
        grid_spec=pltpu.PrefetchScalarGridSpec(
            num_scalar_prefetch=0,
            grid=grid,
            in_specs=[h_spec, x_spec],
            out_specs=o_spec,
        ),
        compiler_params=pltpu.CompilerParams(
            dimension_semantics=("parallel", "parallel", "parallel",
                                 "arbitrary"),
            vmem_limit_bytes=vmem_limit,
        ),
        cost_estimate=cost,
    )(hp, x)

    if N_pad != n_out or W_pad != W:                 # atypical (padded) path
        out = out[:, :n_out, :W]
    return out


class PseudoInverseStore2:
    """JAX/Pallas port of spyrit's PseudoInverseStore2.

    Stores H_pinv = pinv(H) of shape (N, M) (cast once to `compute_dtype`,
    bf16 by default) and applies it to batches of measurement maps x of shape
    (B, M, W), producing (B, N, W) in float32 via a tiled Pallas TPU matmul.
    """

    def __init__(self, H, reg: float = 1e-15, compute_dtype=jnp.bfloat16,
                 tn_max: int = 512, tk_max: int = 1024, tw_max: int = 1024):
        assert tn_max % 8 == 0 and tk_max % 128 == 0 and tw_max % 128 == 0
        H = jnp.asarray(H, jnp.float32)
        M, N = H.shape
        # TODO(synk): pinv (SVD) has no Pallas primitive; it is a one-time
        # __init__ computation, done here with jnp.linalg.pinv (host/XLA).
        H_pinv = jnp.linalg.pinv(H, rcond=reg)       # (N, M), float32
        self.H_pinv = H_pinv                         # full-precision copy
        self.M, self.N = M, N
        self.compute_dtype = jnp.dtype(compute_dtype)
        self.tw_max = tw_max

        # One-time weight prep (kept out of the jitted per-call path): pick the
        # (N, M)-dependent tiles, cast to the compute dtype, pad only if a dim
        # exceeds its tile cap (atypical for this module's shapes).
        self._tn, N_pad = _tile_dim(N, tn_max, 8)
        self._tk, M_pad = _tile_dim(M, tk_max, 128)
        Hp = H_pinv.astype(self.compute_dtype)
        if (N_pad, M_pad) != (N, M):
            Hp = jnp.pad(Hp, ((0, N_pad - N), (0, M_pad - M)))
        self._Hp = Hp

    def __call__(self, x):
        return _pinv_apply(self._Hp, x, n_out=self.N, m_in=self.M,
                           tn=self._tn, tk=self._tk, tw_max=self.tw_max,
                           compute_dtype=self.compute_dtype)


def reference_forward(H_pinv, x):
    """Pure-JAX reference mirroring the PyTorch forward (transpose, Linear,
    transpose) at full float32 precision."""
    hi = jax.lax.Precision.HIGHEST
    xt = jnp.swapaxes(x, 1, 2)                       # (B, W, M)
    yt = jnp.matmul(xt, H_pinv.T, precision=hi)      # (B, W, N)
    return jnp.swapaxes(yt, 1, 2)                    # (B, N, W)


if __name__ == "__main__":
    # Shapes from the module docstring (Example 2): M=63 measurements,
    # N=64 pixels per row, W=92 spatial columns, small batch B=2.
    B, M, N, W = 2, 63, 64, 92

    key = jax.random.PRNGKey(0)
    k1, k2 = jax.random.split(key)
    H = jax.random.normal(k1, (M, N), dtype=jnp.float32)      # meas_op.get_H()
    x = jax.random.normal(k2, (B, M, W), dtype=jnp.float32)   # measurements

    recon_op = PseudoInverseStore2(H, reg=1e-15)   # one-time init (pinv + bf16)
    out = jax.block_until_ready(recon_op(x))

    ref = reference_forward(recon_op.H_pinv, x)
    assert out.shape == (B, N, W), out.shape
    rel_err = float(jnp.linalg.norm(out - ref) / (jnp.linalg.norm(ref) + 1e-8))
    # Accuracy contract: bf16 operands + fp32 accumulation -> expected relative
    # error ~2e-3 vs the Precision.HIGHEST fp32 reference.
    assert rel_err < 1e-2, f"relative error too high: {rel_err}"

    print("KERNEL_OK")
</pallas_src>

<mosaic_0001>
module attributes {stable_mosaic.version = 11 : i64} {
  func.func @_pinv_apply_kernel(%arg0: i32, %arg1: i32, %arg2: i32, %arg3: i32, %arg4: memref<64x63xbf16, #tpu.memory_space<vmem>>, %arg5: memref<1x63x92xf32, #tpu.memory_space<vmem>>, %arg6: memref<1x64x92xf32, #tpu.memory_space<vmem>>) attributes {dimension_semantics = [#tpu.dimension_semantics<parallel>, #tpu.dimension_semantics<parallel>, #tpu.dimension_semantics<parallel>, #tpu.dimension_semantics<arbitrary>], iteration_bounds = array<i64: 2, 1, 1, 1>, scalar_prefetch = 0 : i64, scratch_operands = 0 : i64, tpu.core_type = #tpu.core_type<tc>, window_params = [{transform_indices = @transform_0, window_bounds = array<i64: 64, 63>}, {transform_indices = @transform_1, window_bounds = array<i64: 1, 63, 92>}, {transform_indices = @transform_2, window_bounds = array<i64: 1, 64, 92>}]} {
    %c0 = arith.constant 0 : index
    %c0_0 = arith.constant 0 : index
    %0 = vector.load %arg4[%c0, %c0_0] : memref<64x63xbf16, #tpu.memory_space<vmem>>, vector<64x63xbf16>
    %c0_1 = arith.constant 0 : index
    %c0_2 = arith.constant 0 : index
    %c0_3 = arith.constant 0 : index
    %1 = vector.load %arg5[%c0_1, %c0_2, %c0_3] : memref<1x63x92xf32, #tpu.memory_space<vmem>>, vector<1x63x92xf32>
    %2 = vector.shape_cast %1 : vector<1x63x92xf32> to vector<63x92xf32>
    %3 = arith.truncf %2 : vector<63x92xf32> to vector<63x92xbf16>
    %cst = arith.constant dense<0.000000e+00> : vector<64x92xf32>
    %4 = tpu.matmul %0, %3, %cst {dimension_numbers = #tpu.dot_dimension_numbers<[1], [0], [0], [1], [0, 0, 1, 1], [], []>} : vector<64x63xbf16>, vector<63x92xbf16>, vector<64x92xf32> -> vector<64x92xf32>
    %c0_4 = arith.constant 0 : index
    %c0_5 = arith.constant 0 : index
    %c0_6 = arith.constant 0 : index
    %5 = vector.load %arg6[%c0_4, %c0_5, %c0_6] : memref<1x64x92xf32, #tpu.memory_space<vmem>>, vector<1x64x92xf32>
    %6 = vector.shape_cast %5 : vector<1x64x92xf32> to vector<64x92xf32>
    %7 = vector.shape_cast %4 : vector<64x92xf32> to vector<1x64x92xf32>
    tpu.vector_store %arg6[%c0_4, %c0_5, %c0_6], %7 {strides = array<i32>} : memref<1x64x92xf32, #tpu.memory_space<vmem>>, vector<1x64x92xf32>,
    return
  }
  func.func @transform_0(%arg0: i32, %arg1: i32, %arg2: i32, %arg3: i32) -> (i32, i32) {
    %c0_i32 = arith.constant 0 : i32
    return %arg1, %arg3 : i32, i32
  }
  func.func @transform_1(%arg0: i32, %arg1: i32, %arg2: i32, %arg3: i32) -> (i32, i32, i32) {
    %c0_i32 = arith.constant 0 : i32
    return %arg0, %arg3, %arg2 : i32, i32, i32
  }
  func.func @transform_2(%arg0: i32, %arg1: i32, %arg2: i32, %arg3: i32) -> (i32, i32, i32) {
    %c0_i32 = arith.constant 0 : i32
    return %arg0, %arg1, %arg2 : i32, i32, i32
  }
}

</mosaic_0001>

<bundles_post_ra>
// kernel: _pinv_apply.1
= control target key start
LH: loop header
LB: loop body
LE: loop exit
PB: predicated region body
PF: predicated region fallthrough
CT: control target
= control target key end

     0   :  { %7 = vsyncpa [#allocation3], 0  ;;  %s845_s0 = inlined_call_operand.vmem [shape: bf16[64,63], index: 0, kind: input, shape index: {}]   ;;  %s846_s1 = inlined_call_operand.vmem [shape: f32[2,63,92], index: 1, kind: input, shape index: {}]   ;;  %s847_s2 = inlined_call_operand.hbm [shape: f32[2,64,92], index: 2, kind: output, shape index: {}]  }
   0x1   :  { %9 = vsyncpa [#allocation3 + $0x1], 0  ;;  %s707_s9 = smov 0   ;;  %s709_s10 = smov 0  }
   0x2   :  { %s711_s11 = smov 0   ;;  %s713_s12 = smov 0  }
   0x3   :  { %s715_s13 = smov 0   ;;  %s717_s14 = smov 0  }
   0x4 LB: > { %s492_s15 = sadd.s32 4294967295, %s686_s14   ;;  %s493_s16 = sadd.s32 4294967294, %s686_s14   ;;  %s686_s14 = sphi %s717_s14, %s15_s14   ;;  %s682_s13 = sphi %s715_s13, %s854_s13   ;;  %s678_s12 = sphi %s713_s12, %s853_s12   ;;  %s674_s11 = sphi %s711_s11, %s852_s11   ;;  %s670_s10 = sphi %s709_s10, %s851_s10   ;;  %s666_s9 = sphi %s707_s9, %s850_s9  }
   0x5   : > { %s41_s17 = sadd.s32 1, %s682_s13  ;;  %s110_s18 = sadd.s32 1, %s674_s11 }
   0x6   : > { %p43_p0 = scmp.ge.s32.totalorder %s41_s17, 2  ;;  %p120_p1 = scmp.ne.s32.totalorder %s674_s11, %s670_s10 }
   0x7   : > { %p121_p2 = scmp.eq.s32.totalorder %s492_s15, 1  ;;  %p126_p3 = scmp.ne.s32.totalorder %s670_s10, %s666_s9 }
   0x8   : > { %s856_s17 = smov (%p43_p0, %s41_s17), 0  ;;  %p127_p5 = scmp.eq.s32.totalorder %s493_s16, 1 }
   0x9   : > { %p747_p4 = por %p121_p2, %p120_p1  ;;  %s103_s20 = ssub.s32 %s682_s13, %s856_s17 }
   0xa   : > { %p497_p6 = scmp.ge.s32.totalorder %s686_s14, 1  ;;  %p108_p7 = scmp.eq.s32.totalorder %s103_s20, 0 }
   0xb   : > { %p754_p8 = por %p127_p5, %p126_p3  ;;  %p173_p9 = scmp.lt.s32.totalorder %s686_s14, 3 }
   0xc   : > { %s760_s22 = scalar_select %p108_p7, %s674_s11, %s110_s18  }
   0xd   : > { %p174_p10 = pnand %p497_p6, %p173_p9 }
   0xe   : > { %p220_p11 = scmp.lt.s32.totalorder (!%p174_p10), %s678_s12, 1  ;;  %s207_s8 = sand.u32 (!%p174_p10), 1, %s670_s10  }
   0xf   : > { %177 = sbr.rel (%p174_p10) target bundleno = 258 (0x102), region = 28  ;;  %s498_s15 = sshll.u32 (!%p174_p10), %s207_s8, 6 }
  0x10   : > { %s209_s16 = scalar_lea.vmem (!%p174_p10), [#allocation2], %s498_s15  ;;  %s515_s18 = sshll.u32 (!%p174_p10), %s678_s12, 10 }
  0x11   : > { %s385_s20 = sshll.u32 (!%p174_p10), %s209_s16, 4  ;;  %s792_s25 = scalar_lea.hbm (!%p174_p10), %s847_s2, %s515_s18  ;;  %s794_s20 = int_to_ptr.vmem [resolvable:$true] %s385_s20 }
  0x12   : > { %s610_s26 = scalar_lea.vmem (!%p174_p10), %s794_s20, 1024 }
  0x13   : > { %p611_p12 = scmp.ne.s32.totalorder (!%p174_p10), %s794_s20, %s610_s26 }
  0x14   : > { %vm287_vm0 = vcmask 1046528   ;;  %v606_v0 = vld [vmem:[%s845_s0] sm:$0xff]   ;;  %vm274_vm1 = vcmask 515072   ;;  %v607_v1 = vld [vmem:[%s845_s0 + $0x10] sm:$0xff]   ;;  %s221_s27 = scalar_select %p220_p11, %s678_s12, 1  ;;  %vm288_vm2 = vcmask 1047552  }
  0x15   : > { %v688_v2 = vmov 65535   ;;  %532 = vmatprep.mubr.msk.bf16.mxu0 %vm274_vm1, %v606_v0  ;;  %536 = vmatprep.mubr.msk.bf16.mxu1 %vm274_vm1, %v607_v1  ;;  %v608_v18 = vld [vmem:[%s845_s0 + $0x8] sm:$0xff]   ;;  %v609_v19 = vld [vmem:[%s845_s0 + $0x18] sm:$0xff]   ;;  %vm359_vm3 = vcmask 752640   ;;  %s800_s12 = scalar_lea.sflag [#allocation3], %s207_s8  ;;  %p612_p13 = pnand %p611_p12, %p747_p4 }
  0x16   : > { %v289_v3 = vsel %vm287_vm0, 4294967295, %v688_v2  ;;  %s514_s28 = sshll.u32 %s221_s27, 6  ;;  %s689_s27 = smov [#allocation2]  }
  0x17   : > { %s230_s3 = scalar_lea.vmem %s846_s1, %s514_s28  ;;  %v290_v6 = vsel %vm288_vm2, %v289_v3, 0  ;;  %p613_p0 = pneg %p612_p13 }
  0x18   : > { %v248_v4 = vld [vmem:[%s230_s3 + $0x30] sm:$0xff]  ;;  %v249_v5 = vld [vmem:[%s230_s3 + $0x38] sm:$0x7f]  ;;  %v246_v7 = vld [vmem:[%s230_s3 + $0x20] sm:$0xff]  ;;  %s614_s28 = sshll.u32 %s689_s27, 4  ;;  %s615_s28 = int_to_ptr.vmem [resolvable:$false] %s614_s28 }
  0x19   : > { %v253_v8 = vpack.c.bf16 %v249_v5, %v248_v4  ;;  %v247_v9 = vld [vmem:[%s230_s3 + $0x28] sm:$0xff]  ;;  %v244_v12 = vld [vmem:[%s230_s3 + $0x10] sm:$0xff]  ;;  %v245_v13 = vld [vmem:[%s230_s3 + $0x18] sm:$0xff]  ;;  %s616_s29 = scalar_lea.vmem %s615_s28, 2048  ;;  %p617_p1 = scmp.lt.s32.totalorder %s794_s20, %s615_s28 }
  0x1a   : > { %v252_v11 = vpack.c.bf16 %v247_v9, %v246_v7  ;;  %v251_v14 = vpack.c.bf16 %v245_v13, %v244_v12  ;;  %v242_v15 = vld [vmem:[%s230_s3] sm:$0xff]  ;;  %v243_v16 = vld [vmem:[%s230_s3 + $0x8] sm:$0xff]  ;;  %p618_p2 = scmp.lt.s32.totalorder %s616_s29, %s610_s26 }
  0x1b   : > { %v292_v10 = vand.u32 %v290_v6, %v253_v8  ;;  %v250_v17 = vpack.c.bf16 %v243_v16, %v242_v15 }
  0x1c   : > { %p619_p3 = por %p618_p2, %p617_p1 }
  0x1d   : > { %524 = vmatprep.subr.bf16.mxu0 %v292_v10  ;;  %540 = vmatprep.subr.bf16.mxu1 %v292_v10 }
  0x1e   : > { %525 = vmatpush3.bf16.msra.mxu0 %v292_v10  ;;  %544 = vmatpush3.bf16.msra.mxu1 %v292_v10  ;;  %p620_p5 = pnand %p619_p3, %p613_p0 }
  0x1f   : > { %526 = vmatprep.subr.bf16.mxu0 %v252_v11  ;;  %541 = vmatprep.subr.bf16.mxu1 %v252_v11 }
  0x22   : > { %527 = vmatpush3.bf16.msra.mxu0 %v252_v11  ;;  %545 = vmatpush3.bf16.msra.mxu1 %v252_v11 }
  0x23   : > { %528 = vmatprep.subr.bf16.mxu0 %v251_v14  ;;  %542 = vmatprep.subr.bf16.mxu1 %v251_v14 }
  0x26   : > { %529 = vmatpush3.bf16.msra.mxu0 %v251_v14  ;;  %546 = vmatpush3.bf16.msra.mxu1 %v251_v14 }
  0x27   : > { %530 = vmatprep.subr.bf16.mxu0 %v250_v17  ;;  %543 = vmatprep.subr.bf16.mxu1 %v250_v17 }
  0x2a   : > { %531 = vmatpush3.bf16.msra.mxu0 %v250_v17  ;;  %547 = vmatpush3.bf16.msra.mxu1 %v250_v17 }
  0x2d   : > { %533 = vmatmul.mubr.msk.bf16.vlgmr.msra.gmra.mxu0 %vm274_vm1, %v608_v18  ;;  %537 = vmatmul.mubr.msk.bf16.vlgmr.msra.gmra.mxu1 %vm274_vm1, %v609_v19 }
  0xed   : > { %v534_v20 = vpop.f32.mrf.mxu0  ;;  %v538_v21 = vpop.f32.mrf.mxu1 }
  0xee   : > { %362 = vst.msk [vmem:[%s209_s16 + $0x10] sm:$0xff] %vm359_vm3, %v534_v20  ;;  %366 = vst.msk [vmem:[%s209_s16 + $0x30] sm:$0xff] %vm359_vm3, %v538_v21 }
  0xef   : > { %v328_v22 = vpop.f32.mrf.mxu0  ;;  %v344_v23 = vpop.f32.mrf.mxu1 }
  0xf0   : > { %360 = vst.msk [vmem:[%s209_s16] sm:$0xff] %vm359_vm3, %v328_v22  ;;  %364 = vst.msk [vmem:[%s209_s16 + $0x20] sm:$0xff] %vm359_vm3, %v344_v23 }
  0xf1   : > { %v535_v24 = vpop.f32.mrf.mxu0  ;;  %v539_v25 = vpop.f32.mrf.mxu1 }
  0xf2   : > { %363 = vst.msk [vmem:[%s209_s16 + $0x18] sm:$0xff] %vm359_vm3, %v535_v24  ;;  %367 = vst.msk [vmem:[%s209_s16 + $0x38] sm:$0xff] %vm359_vm3, %v539_v25 }
  0xf3   : > { %v331_v26 = vpop.f32.mrf.mxu0  ;;  %v347_v27 = vpop.f32.mrf.mxu1 }
  0xf4   : > { %361 = vst.msk [vmem:[%s209_s16 + $0x8] sm:$0xff] %vm359_vm3, %v331_v26  ;;  %365 = vst.msk [vmem:[%s209_s16 + $0x28] sm:$0xff] %vm359_vm3, %v347_v27 }
  0xf5   : > { %623 = shalt.err (!%p620_p5)
}
  0xf6   : > { %s624_s30 = scalar_lea.hbm %s792_s25, 1024  ;;  %s628_s5 = scalar_lea.hbm %s847_s2, 2048 }
  0xf7   : > { %p625_p6 = scmp.ne.s32.totalorder %s792_s25, %s624_s30  ;;  %p629_p10 = scmp.lt.s32.totalorder %s792_s25, %s847_s2 }
  0xf8   : > { %p630_p11 = scmp.lt.s32.totalorder %s628_s5, %s624_s30 }
  0xf9   : > { %p626_p7 = pnand %p625_p6, %p747_p4 }
  0xfa   : > { %p631_p12 = por %p630_p11, %p629_p10 }
  0xfb   : > { %p627_p9 = pneg %p626_p7 }
  0xfd   : > { %p632_p13 = pnand %p631_p12, %p627_p9 }
  0xff   : > { %635 = shalt.err (!%p632_p13)
}
 0x100   : > { %s690_s8 = smov 128   ;;  %s691_s15 = smov 8  }
 0x101   : > { %548 = dma.vmem_to_hbm [thread:$0]  (%p747_p4), %s794_s20, 1024, %s792_s25, %s800_s12, %s690_s8, %s690_s8, %s691_s15  }
 0x102 PF: > { %p554_p0 = scmp.ge.s32.totalorder %s686_s14, 2  ;;  %s400_s16 = sand.u32 1, %s666_s9  }
 0x103   : > { %s401_s18 = scalar_lea.sflag [#allocation3], %s400_s16 }
 0x104   : > { %p551_p1 = pnand %p554_p0, %p754_p8 }
 0x106   : > { %p552_p2 = pneg %p551_p1 }
 0x108   : > { %661 = dma.done.wait (%p552_p2), %s401_s18, 1024  }
 0x109   : > { %663 = vsyncadd (%p552_p2), %s401_s18, 4294966272  ;;  %s15_s14 = sadd.s32 1, %s686_s14   ;;  %s850_s9 = smov %s670_s10 }
 0x10a   : > { %p12_p3 = scmp.ge.s32.totalorder %s15_s14, 4   ;;  %s851_s10 = smov %s674_s11 }
 0x10b   : > { %s852_s11 = smov %s760_s22  ;;  %s853_s12 = smov %s682_s13 }
 0x10c   : > { %s854_s13 = smov %s856_s17  ;;  %14 = sbr.rel (!%p12_p3) target bundleno = 4 (0x4), region = 66 }
 0x111   :  { %406 = vsyncpa [#allocation3], 1 }
 0x112   :  { %408 = vsyncpa [#allocation3 + $0x1], 1 }

</bundles_post_ra>
